<compile_context>
chip_gen: v7x
topology: tpu7x:2x2x1
jax: 0.10.0
libtpu: 0.0.40
codegen_flags: <defaults>
</compile_context>

<pallas_src>
import jax
import jax.numpy as jnp
from jax.experimental import pallas as pl
from jax.experimental.pallas import tpu as pltpu

_LANE = 128        # lane width: last dims of blocks kept 128-multiples
_SUBLANE_BF16 = 16 # bf16 packs 16 rows / vreg; row tiles kept 16-multiples
_TM_MAX = 512      # max rows per tile
_TCOL_MAX = 512    # max N / K tile width (multiple of 128; MXU-friendly)


def _cdiv(a, b):
    return (a + b - 1) // b


def _round_up(x, m):
    return ((x + m - 1) // m) * m


def _row_tiling(m):
    """Balanced row tiling: pad only to the bf16 sublane group, then split
    evenly so padding waste is bounded by < one sublane group per tile."""
    m_pad = _round_up(max(m, 1), _SUBLANE_BF16)
    n_tiles = _cdiv(m_pad, _TM_MAX)
    tm = _round_up(_cdiv(m_pad, n_tiles), _SUBLANE_BF16)
    return tm, tm * n_tiles


def _col_tile(n):
    """Tile width for a lane-aligned dim.  If n is not a 128-multiple the
    whole dim is taken as a single (full-extent) block."""
    if n % _LANE != 0:
        return n
    t = min(n, _TCOL_MAX)
    while n % t != 0:
        t -= _LANE
    return t


_VMEM_LIMIT = None


def _vmem_limit_bytes():
    """Generation-aware scoped-VMEM budget: ~3/4 of physical VMEM, clamped to
    [32 MiB, 96 MiB] (v7x: 64 MiB phys -> 48 MiB; v5e/v6e: 128 MiB -> 96 MiB)."""
    global _VMEM_LIMIT
    if _VMEM_LIMIT is None:
        try:
            phys = int(pltpu.get_tpu_info().vmem_capacity_bytes)
        except Exception:
            phys = 64 * 1024 * 1024
        _VMEM_LIMIT = max(32 * 1024 * 1024,
                          min(96 * 1024 * 1024, (phys * 3) // 4))
    return _VMEM_LIMIT


# ---------------------------------------------------------------------------
# Tiled matmul kernel: y = x @ W, x bf16 (tm, tk), W bf16 (tk, tn),
# f32 VMEM accumulator, bf16 output.  Reduction axis (K) is the last grid axis.
# ---------------------------------------------------------------------------
def _matmul_kernel(x_ref, w_ref, o_ref, acc_ref):
    @pl.when(pl.program_id(2) == 0)
    def _():
        acc_ref[...] = jnp.zeros_like(acc_ref)

    acc_ref[...] += jnp.dot(x_ref[...], w_ref[...],
                            preferred_element_type=jnp.float32)

    @pl.when(pl.program_id(2) == pl.num_programs(2) - 1)
    def _():
        o_ref[...] = acc_ref[...].astype(o_ref.dtype)


def linear_forward(x, w_kn, out_features):
    """x: (..., K) float; w_kn: (K, N_pad) bf16 pre-transposed weight
    (N_pad a 128-multiple).  Returns bf16 (..., out_features)."""
    k, n_pad = w_kn.shape
    lead = x.shape[:-1]
    x2d = x.reshape(-1, k)
    if x2d.dtype != jnp.bfloat16:           # one cast at the model boundary;
        x2d = x2d.astype(jnp.bfloat16)      # later layers arrive already bf16
    m = x2d.shape[0]

    tm, m_pad = _row_tiling(m)
    if m_pad != m:                          # skip the pad copy when aligned
        x2d = jnp.pad(x2d, ((0, m_pad - m), (0, 0)))
    tk = _col_tile(k)
    tn = _col_tile(n_pad)
    grid = (m_pad // tm, n_pad // tn, k // tk)

    cost = pl.CostEstimate(
        flops=2 * m_pad * n_pad * k,
        transcendentals=0,
        bytes_accessed=(m_pad * k + k * n_pad + m_pad * n_pad) * 2,
    )

    y = pl.pallas_call(
        _matmul_kernel,
        out_shape=jax.ShapeDtypeStruct((m_pad, n_pad), jnp.bfloat16),
        grid_spec=pltpu.PrefetchScalarGridSpec(
            num_scalar_prefetch=0,
            grid=grid,
            in_specs=[
                pl.BlockSpec((tm, tk), lambda i, j, kk: (i, kk)),  # x row tile
                pl.BlockSpec((tk, tn), lambda i, j, kk: (kk, j)),  # W tile
            ],
            out_specs=pl.BlockSpec((tm, tn), lambda i, j, kk: (i, j)),
            scratch_shapes=[pltpu.VMEM((tm, tn), jnp.float32)],
        ),
        compiler_params=pltpu.CompilerParams(
            # M and N parallel (on v7x the two TCs can split N, so each core
            # streams only half the weight); K is the resident-accumulator axis.
            dimension_semantics=("parallel", "parallel", "arbitrary"),
            vmem_limit_bytes=_vmem_limit_bytes(),
        ),
        cost_estimate=cost,
    )(x2d, w_kn)

    if m_pad != m or n_pad != out_features:  # slice only when actually padded
        y = y[:m, :out_features]
    return y.reshape(*lead, out_features)


# ---------------------------------------------------------------------------
# Modules
# ---------------------------------------------------------------------------
class PallasLinear:
    """nn.Linear(in, out, bias=False) backed by the tiled Pallas MXU kernel.
    Weight is padded to a 128-multiple N, transposed to (K, N_pad) and cast to
    bf16 once at init (MXU-native streaming layout, lane-dense output)."""

    def __init__(self, in_features, out_features, key, dtype=jnp.float32):
        self.in_features = in_features
        self.out_features = out_features
        scale = 1.0 / (in_features ** 0.5)
        self.weight = jax.random.uniform(
            key, (out_features, in_features), dtype, -scale, scale)
        n_pad = _round_up(out_features, _LANE)
        w_kn = jnp.pad(self.weight, ((0, n_pad - out_features), (0, 0))).T
        self._w_kn = w_kn.astype(jnp.bfloat16)

    def __call__(self, x):
        return linear_forward(x, self._w_kn, self.out_features)


class ZeroOut:
    """nn.Linear(in, out, bias=False) with a frozen all-zero weight.
    Intentionally NOT a Pallas kernel (perf review): an opaque custom call
    would force a full HBM zero write that XLA cannot constant-fold; jnp.zeros
    folds/fuses away entirely."""

    def __init__(self, in_features, out_features):
        self.in_features = in_features
        self.out_features = out_features
        self.weight = jnp.zeros((out_features, in_features), jnp.float32)
        self.bias = None

    def __call__(self, x):
        return jnp.zeros(x.shape[:-1] + (self.out_features,), x.dtype)


class EncoderDecoder:
    """Standard Encoder-Decoder container: pure composition of the injected
    callables, no computation of its own (matches the PyTorch spec)."""

    def __init__(self, encoder, decoder, src_embed, tgt_embed, generator):
        self.encoder = encoder
        self.decoder = decoder
        self.src_embed = src_embed
        self.tgt_embed = tgt_embed
        self.generator = generator

    def __call__(self, src, tgt, src_mask, tgt_mask):
        return self.decode(self.encode(src, src_mask), src_mask, tgt, tgt_mask)

    forward = __call__

    def encode(self, src, src_mask):
        return self.encoder(self.src_embed(src), src_mask)

    def decode(self, memory, src_mask, tgt, tgt_mask):
        return self.decoder(self.tgt_embed(tgt), memory, src_mask, tgt_mask)


if __name__ == "__main__":
    key = jax.random.PRNGKey(0)
    k_src, k_tgt, k_se, k_te, k_enc, k_dec = jax.random.split(key, 6)

    batch, seq, d_in, hidden = 2, 8, 32, 128

    src = jax.random.normal(k_src, (batch, seq, d_in), jnp.float32)
    tgt = jax.random.normal(k_tgt, (batch, seq, d_in), jnp.float32)
    src_mask = jnp.ones((batch, 1, seq), jnp.float32)
    tgt_mask = jnp.ones((batch, seq, seq), jnp.float32)

    # Injected submodules (the spec leaves them undefined; Pallas stand-ins).
    src_embed = PallasLinear(d_in, hidden, k_se)
    tgt_embed = PallasLinear(d_in, hidden, k_te)
    enc_proj = PallasLinear(hidden, hidden, k_enc)
    dec_self = PallasLinear(hidden, hidden, k_dec)
    generator = ZeroOut(hidden, hidden)    # stored by the spec, unused in forward

    # TODO(synk): the spec's real encoder/decoder are constructor-injected
    # attention stacks (MHA + layernorm + FFN) that consume the masks; the
    # stand-ins here are mask-agnostic Pallas projections.  Cross-module fusion
    # of src_embed->encoder into one pallas_call (perf-review item) is not done
    # because the spec's encode() invokes them as two separate injected modules.
    encoder = lambda x, mask: enc_proj(x)
    # Frozen-zero cross term removed entirely (adds 0; constant-folds away).
    decoder = lambda x, memory, s_mask, t_mask: dec_self(x)

    model = EncoderDecoder(encoder, decoder, src_embed, tgt_embed, generator)

    out = jax.block_until_ready(model(src, tgt, src_mask, tgt_mask))
    memory = jax.block_until_ready(model.encode(src, src_mask))

    # ----- reference (plain JAX, same bf16-MXU / f32-accumulate numerics) ----
    def linear_ref(x, w_nk):
        y = jnp.dot(x.astype(jnp.bfloat16), w_nk.astype(jnp.bfloat16).T,
                    preferred_element_type=jnp.float32)
        return y.astype(jnp.bfloat16)

    ref_memory = linear_ref(linear_ref(src, src_embed.weight), enc_proj.weight)
    ref_out = linear_ref(linear_ref(tgt, tgt_embed.weight), dec_self.weight)

    assert out.shape == (batch, seq, hidden), out.shape
    assert out.dtype == jnp.bfloat16, out.dtype
    assert bool(jnp.allclose(memory.astype(jnp.float32),
                             ref_memory.astype(jnp.float32),
                             rtol=2e-2, atol=2e-2))
    assert bool(jnp.allclose(out.astype(jnp.float32),
                             ref_out.astype(jnp.float32),
                             rtol=2e-2, atol=2e-2))

    # ZeroOut path: constant-folded zeros (no Pallas kernel needed).
    z = generator(memory)
    assert z.shape == memory.shape and z.dtype == memory.dtype
    assert bool(jnp.all(z == 0.0))

    # ----- larger-shape smoke test: exercises M/N/K tiling + accumulator -----
    kx, kw = jax.random.split(jax.random.PRNGKey(1))
    big_in, big_out = 1024, 640
    xb = jax.random.normal(kx, (4, 130, big_in), jnp.float32)   # ragged M=520
    big = PallasLinear(big_in, big_out, kw)
    yb = jax.block_until_ready(big(xb))
    yb_ref = linear_ref(xb, big.weight)
    assert yb.shape == (4, 130, big_out), yb.shape
    assert bool(jnp.allclose(yb.astype(jnp.float32),
                             yb_ref.astype(jnp.float32),
                             rtol=2e-2, atol=2e-2))

    print("KERNEL_OK")
</pallas_src>

<mosaic_0001>
module attributes {stable_mosaic.version = 11 : i64} {
  func.func @_matmul_kernel(%arg0: i32, %arg1: i32, %arg2: i32, %arg3: memref<16x32xbf16, #tpu.memory_space<vmem>>, %arg4: memref<32x128xbf16, #tpu.memory_space<vmem>>, %arg5: memref<16x128xbf16, #tpu.memory_space<vmem>>, %arg6: memref<16x128xf32, #tpu.memory_space<vmem>>) attributes {dimension_semantics = [#tpu.dimension_semantics<parallel>, #tpu.dimension_semantics<parallel>, #tpu.dimension_semantics<arbitrary>], iteration_bounds = array<i64: 1, 1, 1>, scalar_prefetch = 0 : i64, scratch_operands = 1 : i64, tpu.core_type = #tpu.core_type<tc>, window_params = [{transform_indices = @transform_0, window_bounds = array<i64: 16, 32>}, {transform_indices = @transform_1, window_bounds = array<i64: 32, 128>}, {transform_indices = @transform_2, window_bounds = array<i64: 16, 128>}]} {
    %c0_i32 = arith.constant 0 : i32
    %0 = arith.cmpi eq, %arg2, %c0_i32 : i32
    %1 = arith.extui %0 : i1 to i32
    %c0_i32_0 = arith.constant 0 : i32
    %2 = arith.cmpi ne, %1, %c0_i32_0 : i32
    scf.if %2 {
      %cst_10 = arith.constant 0.000000e+00 : f32
      %12 = vector.broadcast %cst_10 : f32 to vector<16x128xf32>
      %c0_11 = arith.constant 0 : index
      %c0_12 = arith.constant 0 : index
      %13 = vector.load %arg6[%c0_11, %c0_12] : memref<16x128xf32, #tpu.memory_space<vmem>>, vector<16x128xf32>
      tpu.vector_store %arg6[%c0_11, %c0_12], %12 {strides = array<i32>} : memref<16x128xf32, #tpu.memory_space<vmem>>, vector<16x128xf32>,
    } else {
    }
    %c0 = arith.constant 0 : index
    %c0_1 = arith.constant 0 : index
    %3 = vector.load %arg6[%c0, %c0_1] : memref<16x128xf32, #tpu.memory_space<vmem>>, vector<16x128xf32>
    %c0_2 = arith.constant 0 : index
    %c0_3 = arith.constant 0 : index
    %4 = vector.load %arg3[%c0_2, %c0_3] : memref<16x32xbf16, #tpu.memory_space<vmem>>, vector<16x32xbf16>
    %c0_4 = arith.constant 0 : index
    %c0_5 = arith.constant 0 : index
    %5 = vector.load %arg4[%c0_4, %c0_5] : memref<32x128xbf16, #tpu.memory_space<vmem>>, vector<32x128xbf16>
    %cst = arith.constant dense<0.000000e+00> : vector<16x128xf32>
    %6 = tpu.matmul %4, %5, %cst {dimension_numbers = #tpu.dot_dimension_numbers<[1], [0], [0], [1], [0, 0, 1, 1], [], []>} : vector<16x32xbf16>, vector<32x128xbf16>, vector<16x128xf32> -> vector<16x128xf32>
    %7 = arith.addf %3, %6 : vector<16x128xf32>
    %c0_6 = arith.constant 0 : index
    %c0_7 = arith.constant 0 : index
    %8 = vector.load %arg6[%c0_6, %c0_7] : memref<16x128xf32, #tpu.memory_space<vmem>>, vector<16x128xf32>
    tpu.vector_store %arg6[%c0_6, %c0_7], %7 {strides = array<i32>} : memref<16x128xf32, #tpu.memory_space<vmem>>, vector<16x128xf32>,
    %c0_i32_8 = arith.constant 0 : i32
    %9 = arith.cmpi eq, %arg2, %c0_i32_8 : i32
    %10 = arith.extui %9 : i1 to i32
    %c0_i32_9 = arith.constant 0 : i32
    %11 = arith.cmpi ne, %10, %c0_i32_9 : i32
    scf.if %11 {
      %c0_10 = arith.constant 0 : index
      %c0_11 = arith.constant 0 : index
      %12 = vector.load %arg6[%c0_10, %c0_11] : memref<16x128xf32, #tpu.memory_space<vmem>>, vector<16x128xf32>
      %13 = arith.truncf %12 : vector<16x128xf32> to vector<16x128xbf16>
      %c0_12 = arith.constant 0 : index
      %c0_13 = arith.constant 0 : index
      %14 = vector.load %arg5[%c0_12, %c0_13] : memref<16x128xbf16, #tpu.memory_space<vmem>>, vector<16x128xbf16>
      tpu.vector_store %arg5[%c0_12, %c0_13], %13 {strides = array<i32>} : memref<16x128xbf16, #tpu.memory_space<vmem>>, vector<16x128xbf16>,
    } else {
    }
    return
  }
  func.func @transform_0(%arg0: i32, %arg1: i32, %arg2: i32) -> (i32, i32) {
    %c0_i32 = arith.constant 0 : i32
    return %arg0, %arg2 : i32, i32
  }
  func.func @transform_1(%arg0: i32, %arg1: i32, %arg2: i32) -> (i32, i32) {
    %c0_i32 = arith.constant 0 : i32
    return %arg2, %arg1 : i32, i32
  }
  func.func @transform_2(%arg0: i32, %arg1: i32, %arg2: i32) -> (i32, i32) {
    %c0_i32 = arith.constant 0 : i32
    return %arg0, %arg1 : i32, i32
  }
}

</mosaic_0001>

<bundles_post_ra>
// kernel: tpu_custom_call.1
= control target key start
LH: loop header
LB: loop body
LE: loop exit
PB: predicated region body
PF: predicated region fallthrough
CT: control target
= control target key end

     0   :  { %7 = vsyncpa [#allocation4], 0  ;;  %s327_s0 = inlined_call_operand.hbm [shape: bf16[16,32], index: 0, kind: input, shape index: {}]   ;;  %s328_s1 = inlined_call_operand.hbm [shape: bf16[32,128], index: 1, kind: input, shape index: {}]   ;;  %s329_s2 = inlined_call_operand.hbm [shape: bf16[16,128], index: 2, kind: output, shape index: {}]  }
   0x1   :  { %8 = vsyncpa [#allocation7], 0 }
   0x2   :  { %9 = vsyncpa [#allocation5], 0  ;;  %s260_s9 = smov [#allocation3]   ;;  %s188_s13 = scalar_lea.hbm %s327_s0, 128 }
   0x3   :  { %s15_s10 = sshll.u32 %s260_s9, 4  ;;  %p189_p0 = scmp.ne.s32.totalorder %s327_s0, %s188_s13  ;;  %s16_s10 = int_to_ptr.vmem [resolvable:$true] %s15_s10 }
   0x4   :  { %p192_p1 = scmp.lt.u32.totalorder %s188_s13, %s327_s0 }
   0x6   :  { %p194_p2 = pnand %p192_p1, %p189_p0 }
   0x8   :  { %197 = shalt.err (!%p194_p2)
}
   0x9   :  { %s198_s18 = scalar_lea.vmem %s16_s10, 128  ;;  %p203_p4 = scmp.lt.s32.totalorder %s16_s10, %s16_s10 }
   0xa   :  { %p199_p3 = scmp.ne.s32.totalorder %s16_s10, %s198_s18  ;;  %p204_p5 = scmp.lt.s32.totalorder %s198_s18, %s198_s18 }
   0xc   :  { %p205_p6 = por %p204_p5, %p203_p4 }
   0xe   :  { %p206_p7 = pnand %p205_p6, %p199_p3 }
  0x10   :  { %209 = shalt.err (!%p206_p7)
}
  0x11   :  { %s261_s19 = smov 64   ;;  %s262_s20 = smov 4  }
  0x12   :  { %21 = dma.hbm_to_vmem [thread:$0]  %s327_s0, 128, %s16_s10, [#allocation4], %s261_s19, %s261_s19, %s262_s20  }
  0x13   :  { %s263_s23 = smov [#allocation6]   ;;  %s210_s27 = scalar_lea.hbm %s328_s1, 256 }
  0x14   :  { %s27_s24 = sshll.u32 %s263_s23, 4  ;;  %p211_p8 = scmp.ne.s32.totalorder %s328_s1, %s210_s27  ;;  %s28_s24 = int_to_ptr.vmem [resolvable:$true] %s27_s24 }
  0x15   :  { %p214_p9 = scmp.lt.u32.totalorder %s210_s27, %s328_s1 }
  0x17   :  { %p216_p10 = pnand %p214_p9, %p211_p8 }
  0x19   :  { %219 = shalt.err (!%p216_p10)
}
  0x1a   :  { %s220_s4 = scalar_lea.vmem %s28_s24, 256  ;;  %p225_p12 = scmp.lt.s32.totalorder %s28_s24, %s28_s24 }
  0x1b   :  { %p221_p11 = scmp.ne.s32.totalorder %s28_s24, %s220_s4  ;;  %p226_p13 = scmp.lt.s32.totalorder %s220_s4, %s220_s4 }
  0x1d   :  { %p227_p0 = por %p226_p13, %p225_p12 }
  0x1f   :  { %p228_p1 = pnand %p227_p0, %p221_p11 }
  0x21   :  { %231 = shalt.err (!%p228_p1)
}
  0x22   :  { %33 = dma.hbm_to_vmem [thread:$0]  %s328_s1, 256, %s28_s24, [#allocation7], %s261_s19, %s261_s19, %s262_s20  }
  0x23   :  { %254 = dma.done.wait [#allocation4], 128  }
  0x24   :  { %255 = vsyncadd [#allocation4], 4294967168 }
  0x25   :  { %256 = dma.done.wait [#allocation7], 256  }
  0x26   :  { %257 = vsyncadd [#allocation7], 4294967040  ;;  %v264_v0 = vmov 0.0   ;;  %vm265_vm0 = vmmov 0   ;;  %v185_v1 = vld [vmem:[#allocation6] sm:$0xff]   ;;  %v186_v2 = vld [vmem:[#allocation6 + $0x8] sm:$0xff]  }
  0x27   :  { %170 = vmatprep.subr.bf16.mxu0 %v264_v0  ;;  %174 = vmatprep.mubr.msk.bf16.mxu0 %vm265_vm0, %v264_v0  ;;  %v187_v3 = vld [vmem:[#allocation3] sm:$0xff]   ;;  %vm72_vm1 = vcmask 261120   ;;  %s266_s6 = smov [#allocation8]  }
  0x28   :  { %171 = vmatpush3.bf16.msra.mxu0 %v185_v1  ;;  %s141_s7 = sshll.u32 %s266_s6, 4  ;;  %s142_s7 = int_to_ptr.vmem [resolvable:$true] %s141_s7 }
  0x29   :  { %172 = vmatprep.subr.bf16.mxu0 %v264_v0  ;;  %s232_s1 = scalar_lea.vmem %s142_s7, 128  ;;  %p237_p3 = scmp.lt.s32.totalorder %s142_s7, %s142_s7 }
  0x2a   :  { %p233_p2 = scmp.ne.s32.totalorder %s142_s7, %s232_s1  ;;  %p238_p4 = scmp.lt.s32.totalorder %s232_s1, %s232_s1 }
  0x2c   :  { %173 = vmatpush3.bf16.msra.mxu0 %v186_v2  ;;  %p239_p5 = por %p238_p4, %p237_p3 }
  0x2e   :  { %p240_p6 = pnand %p239_p5, %p233_p2 }
  0x2f   :  { %175 = vmatmul.mubr.msk.bf16.vlgmr.msra.gmra.mrb[0].mxu0 %vm72_vm1, %v187_v3 }
 0x102   :  { %v110_v4 = vpop.f32.mrb[0].mxu0 }
 0x103   :  { %v176_v5 = vpop.f32.mrb[1].mxu0 }
 0x104   :  { %v113_v6 = vpop.f32.mrb[2].mxu0 }
 0x105   :  { %v165_v7 = vpack.c.bf16 %v113_v6, %v110_v4  ;;  %v177_v8 = vpop.f32.mrb[3].mxu0 }
 0x107   :  { %166 = vst [vmem:[#allocation8] sm:$0xff] %v165_v7  }
 0x108   :  { %243 = shalt.err (!%p240_p6)
}
 0x109   :  { %s244_s10 = scalar_lea.hbm %s329_s2, 128 }
 0x10a   :  { %p245_p7 = scmp.ne.s32.totalorder %s329_s2, %s244_s10  ;;  %p248_p8 = scmp.lt.u32.totalorder %s244_s10, %s329_s2 }
 0x10c   :  { %p250_p9 = pnand %p248_p8, %p245_p7 }
 0x10e   :  { %253 = shalt.err (!%p250_p9)
}
 0x10f   :  { %147 = dma.vmem_to_hbm [thread:$0]  %s142_s7, 128, %s329_s2, [#allocation5], %s261_s19, %s261_s19, %s262_s20  }
 0x110   :  { %258 = dma.done.wait [#allocation5], 128  }
 0x111   :  { %259 = vsyncadd [#allocation5], 4294967168 }
 0x112   :  { %151 = vsyncpa [#allocation4], 1 }
 0x113   :  { %152 = vsyncpa [#allocation7], 1 }
 0x114   :  { %153 = vsyncpa [#allocation5], 1 }

</bundles_post_ra>
